<compile_context>
chip_gen: v7x
topology: tpu7x:2x2x1
jax: 0.10.0
libtpu: 0.0.40
codegen_flags: <defaults>
</compile_context>

<pallas_src>
import math

import jax
import jax.numpy as jnp
from jax.experimental import pallas as pl
from jax.experimental.pallas import tpu as pltpu


LANE = 128


def _round_up(x, m):
    return (x + m - 1) // m * m


# ----------------------------- Pallas kernel --------------------------------
def _dmtl_forward_kernel(task_idx_ref,   # SMEM scalar prefetch (used only by index_maps)
                         x_ref,          # [tm, input_dim]
                         w_h_ref,        # [input_dim, hidden_dim]   (pre-transposed)
                         b_h_ref,        # [1, hidden_dim]
                         w_c_ref,        # [hidden_dim, class_pad]   (per-task slice)
                         b_c_ref,        # [1, class_pad]            (per-task slice)
                         o_ref):         # [tm, class_pad]
    del task_idx_ref
    # hidden = relu(x @ W_h + b_h) — MXU matmul, f32 accumulation, no transpose.
    h = jnp.dot(x_ref[...], w_h_ref[...], preferred_element_type=jnp.float32)
    h = jnp.maximum(h + b_h_ref[...], 0.0)
    # out = hidden @ W_c + b_c — W_c already [hidden, class_pad] (lane-dense N).
    out = jnp.dot(h, w_c_ref[...], preferred_element_type=jnp.float32)
    o_ref[...] = (out + b_c_ref[...]).astype(o_ref.dtype)


# ------------------------ one-time parameter layout --------------------------
def prepare_params(hidden_w, hidden_b, cls_weight, cls_bias):
    """Re-layout PyTorch-style parameters once for the kernel.

    hidden_w   [hidden_dim, input_dim]           -> [input_dim, hidden_dim]
    hidden_b   [hidden_dim]                      -> [1, hidden_dim]
    cls_weight [task_num, class_num, hidden_dim] -> [task_num, hidden_dim, class_pad]
    cls_bias   [task_num, class_num]             -> [task_num, 1, class_pad]
    """
    hidden_dim, _ = hidden_w.shape
    task_num, class_num, _ = cls_weight.shape
    class_pad = _round_up(class_num, LANE)

    w_h = jnp.asarray(hidden_w, jnp.float32).T
    b_h = jnp.asarray(hidden_b, jnp.float32).reshape(1, hidden_dim)

    w_c = jnp.transpose(jnp.asarray(cls_weight, jnp.float32), (0, 2, 1))
    w_c = jnp.pad(w_c, ((0, 0), (0, 0), (0, class_pad - class_num)))
    b_c = jnp.asarray(cls_bias, jnp.float32).reshape(task_num, 1, class_num)
    b_c = jnp.pad(b_c, ((0, 0), (0, 0), (0, class_pad - class_num)))
    return w_h, b_h, w_c, b_c, class_num


# --------------------------------- wrapper -----------------------------------
def dmtl_forward(x, prepared, task_index):
    """Pallas-backed forward pass of DMTL_net_ using pre-laid-out params."""
    w_h, b_h, w_c, b_c, class_num = prepared
    if x.ndim < 2:                      # mirrors inputs.unsqueeze(0)
        x = x[None, :]
    x = jnp.asarray(x, jnp.float32)
    B, input_dim = x.shape
    hidden_dim = w_h.shape[1]
    class_pad = w_c.shape[2]

    # Batch tiling: full extent when small, 128-row tiles (zero-padded) when large.
    if B <= 128:
        tm, Bp = B, B
    else:
        tm = 128
        Bp = _round_up(B, tm)
    if Bp != B:
        x = jnp.pad(x, ((0, Bp - B), (0, 0)))

    task = jnp.asarray(task_index, jnp.int32).reshape((1,))

    grid_spec = pltpu.PrefetchScalarGridSpec(
        num_scalar_prefetch=1,
        grid=(Bp // tm,),
        in_specs=[
            pl.BlockSpec((tm, input_dim), lambda i, t: (i, 0)),
            pl.BlockSpec((input_dim, hidden_dim), lambda i, t: (0, 0)),
            pl.BlockSpec((1, hidden_dim), lambda i, t: (0, 0)),
            # Task selection happens here via the scalar-prefetch ref.
            pl.BlockSpec((None, hidden_dim, class_pad), lambda i, t: (t[0], 0, 0)),
            pl.BlockSpec((None, 1, class_pad), lambda i, t: (t[0], 0, 0)),
        ],
        out_specs=pl.BlockSpec((tm, class_pad), lambda i, t: (i, 0)),
    )

    out = pl.pallas_call(
        _dmtl_forward_kernel,
        grid_spec=grid_spec,
        out_shape=jax.ShapeDtypeStruct((Bp, class_pad), jnp.float32),
        compiler_params=pltpu.CompilerParams(
            dimension_semantics=("parallel",),
            vmem_limit_bytes=32 * 1024 * 1024,
        ),
    )(task, x, w_h, b_h, w_c, b_c)

    # Strip batch and class padding (lane-dense inside the kernel only).
    return out[:B, :class_num]


# ----------------------- deterministic parameter init -----------------------
def init_params(key, input_dim, hidden_dim, class_num, task_num):
    """Deterministic init mimicking the PyTorch module's shapes/distributions."""
    k1, k2, k3, k4 = jax.random.split(key, 4)

    # nn.Linear default: kaiming_uniform(a=sqrt(5)) ≡ U(-1/sqrt(fan_in), 1/sqrt(fan_in))
    bound_h = 1.0 / math.sqrt(input_dim)
    hidden_w = jax.random.uniform(k1, (hidden_dim, input_dim),
                                  minval=-bound_h, maxval=bound_h, dtype=jnp.float32)
    hidden_b = jax.random.uniform(k2, (hidden_dim,),
                                  minval=-bound_h, maxval=bound_h, dtype=jnp.float32)

    # cls_weight[i]: kaiming_uniform(a=sqrt(5)) on [class_num, hidden_dim] (fan_in=hidden_dim)
    bound_c = 1.0 / math.sqrt(hidden_dim)
    cls_weight = jax.random.uniform(k3, (task_num, class_num, hidden_dim),
                                    minval=-bound_c, maxval=bound_c, dtype=jnp.float32)
    cls_bias = jax.random.uniform(k4, (task_num, class_num),
                                  minval=-bound_c, maxval=bound_c, dtype=jnp.float32)
    return hidden_w, hidden_b, cls_weight, cls_bias


# ---------------------------------- main -------------------------------------
if __name__ == "__main__":
    B, INPUT_DIM, HIDDEN_DIM, CLASS_NUM, TASK_NUM = 8, 32, 128, 5, 3
    TASK_INDEX = 1

    key = jax.random.PRNGKey(0)
    k_x, k_p = jax.random.split(key)
    x = jax.random.normal(k_x, (B, INPUT_DIM), dtype=jnp.float32)
    hidden_w, hidden_b, cls_weight, cls_bias = init_params(
        k_p, INPUT_DIM, HIDDEN_DIM, CLASS_NUM, TASK_NUM)

    prepared = prepare_params(hidden_w, hidden_b, cls_weight, cls_bias)
    out = dmtl_forward(x, prepared, TASK_INDEX)
    out = jax.block_until_ready(out)

    # Pure-JAX reference check of the forward semantics (PyTorch layout).
    ref_h = jnp.maximum(x @ hidden_w.T + hidden_b, 0.0)
    ref_out = ref_h @ cls_weight[TASK_INDEX].T + cls_bias[TASK_INDEX]
    assert out.shape == (B, CLASS_NUM)
    assert jnp.allclose(out, ref_out, atol=1e-5, rtol=1e-5)

    # TODO(synk): get_regular_term (sum of squared Frobenius norms) is training-time
    # regularization glue, not part of the forward pass; left as plain JAX if needed.
    print("KERNEL_OK")
</pallas_src>

<mosaic_0001>
module attributes {stable_mosaic.version = 11 : i64} {
  func.func @_dmtl_forward_kernel(%arg0: i32, %arg1: memref<1xi32, #tpu.memory_space<smem>>, %arg2: memref<8x32xf32, #tpu.memory_space<vmem>>, %arg3: memref<32x128xf32, #tpu.memory_space<vmem>>, %arg4: memref<1x128xf32, #tpu.memory_space<vmem>>, %arg5: memref<1x128x128xf32, #tpu.memory_space<vmem>>, %arg6: memref<1x1x128xf32, #tpu.memory_space<vmem>>, %arg7: memref<8x128xf32, #tpu.memory_space<vmem>>) attributes {dimension_semantics = [#tpu.dimension_semantics<parallel>], iteration_bounds = array<i64: 1>, scalar_prefetch = 1 : i64, scratch_operands = 0 : i64, tpu.core_type = #tpu.core_type<tc>, window_params = [{transform_indices = @transform_0, window_bounds = array<i64: 8, 32>}, {pipeline_mode = #tpu.pipeline_mode<synchronous>, transform_indices = @transform_1, window_bounds = array<i64: 32, 128>}, {pipeline_mode = #tpu.pipeline_mode<synchronous>, transform_indices = @transform_2, window_bounds = array<i64: 1, 128>}, {transform_indices = @transform_3, window_bounds = array<i64: 1, 128, 128>}, {transform_indices = @transform_4, window_bounds = array<i64: 1, 1, 128>}, {transform_indices = @transform_5, window_bounds = array<i64: 8, 128>}]} {
    %c0 = arith.constant 0 : index
    %c0_0 = arith.constant 0 : index
    %0 = vector.load %arg2[%c0, %c0_0] : memref<8x32xf32, #tpu.memory_space<vmem>>, vector<8x32xf32>
    %c0_1 = arith.constant 0 : index
    %c0_2 = arith.constant 0 : index
    %1 = vector.load %arg3[%c0_1, %c0_2] : memref<32x128xf32, #tpu.memory_space<vmem>>, vector<32x128xf32>
    %cst = arith.constant dense<0.000000e+00> : vector<8x128xf32>
    %2 = tpu.matmul %0, %1, %cst {dimension_numbers = #tpu.dot_dimension_numbers<[1], [0], [0], [1], [0, 0, 1, 1], [], []>} : vector<8x32xf32>, vector<32x128xf32>, vector<8x128xf32> -> vector<8x128xf32>
    %c0_3 = arith.constant 0 : index
    %c0_4 = arith.constant 0 : index
    %3 = vector.load %arg4[%c0_3, %c0_4] : memref<1x128xf32, #tpu.memory_space<vmem>>, vector<1x128xf32>
    %4 = vector.broadcast %3 : vector<1x128xf32> to vector<8x128xf32>
    %5 = arith.addf %2, %4 : vector<8x128xf32>
    %cst_5 = arith.constant 0.000000e+00 : f32
    %6 = vector.broadcast %cst_5 : f32 to vector<8x128xf32>
    %7 = arith.maximumf %5, %6 : vector<8x128xf32>
    %c0_6 = arith.constant 0 : index
    %c0_7 = arith.constant 0 : index
    %c0_8 = arith.constant 0 : index
    %8 = vector.load %arg5[%c0_6, %c0_7, %c0_8] : memref<1x128x128xf32, #tpu.memory_space<vmem>>, vector<1x128x128xf32>
    %9 = vector.shape_cast %8 : vector<1x128x128xf32> to vector<128x128xf32>
    %cst_9 = arith.constant dense<0.000000e+00> : vector<8x128xf32>
    %10 = tpu.matmul %7, %9, %cst_9 {dimension_numbers = #tpu.dot_dimension_numbers<[1], [0], [0], [1], [0, 0, 1, 1], [], []>} : vector<8x128xf32>, vector<128x128xf32>, vector<8x128xf32> -> vector<8x128xf32>
    %c0_10 = arith.constant 0 : index
    %c0_11 = arith.constant 0 : index
    %c0_12 = arith.constant 0 : index
    %11 = vector.load %arg6[%c0_10, %c0_11, %c0_12] : memref<1x1x128xf32, #tpu.memory_space<vmem>>, vector<1x1x128xf32>
    %12 = vector.shape_cast %11 : vector<1x1x128xf32> to vector<1x128xf32>
    %13 = vector.broadcast %12 : vector<1x128xf32> to vector<8x128xf32>
    %14 = arith.addf %10, %13 : vector<8x128xf32>
    %c0_13 = arith.constant 0 : index
    %c0_14 = arith.constant 0 : index
    %15 = vector.load %arg7[%c0_13, %c0_14] : memref<8x128xf32, #tpu.memory_space<vmem>>, vector<8x128xf32>
    tpu.vector_store %arg7[%c0_13, %c0_14], %14 {strides = array<i32>} : memref<8x128xf32, #tpu.memory_space<vmem>>, vector<8x128xf32>,
    return
  }
  func.func @transform_0(%arg0: i32, %arg1: memref<1xi32, #tpu.memory_space<smem>>) -> (i32, i32) {
    %c0_i32 = arith.constant 0 : i32
    %c0_i32_0 = arith.constant 0 : i32
    return %arg0, %c0_i32 : i32, i32
  }
  func.func @transform_1(%arg0: i32, %arg1: memref<1xi32, #tpu.memory_space<smem>>) -> (i32, i32) {
    %c0_i32 = arith.constant 0 : i32
    %c0_i32_0 = arith.constant 0 : i32
    %c0_i32_1 = arith.constant 0 : i32
    return %c0_i32, %c0_i32_0 : i32, i32
  }
  func.func @transform_2(%arg0: i32, %arg1: memref<1xi32, #tpu.memory_space<smem>>) -> (i32, i32) {
    %c0_i32 = arith.constant 0 : i32
    %c0_i32_0 = arith.constant 0 : i32
    %c0_i32_1 = arith.constant 0 : i32
    return %c0_i32, %c0_i32_0 : i32, i32
  }
  func.func @transform_3(%arg0: i32, %arg1: memref<1xi32, #tpu.memory_space<smem>>) -> (i32, i32, i32) {
    %c0 = arith.constant 0 : index
    %0 = memref.load %arg1[%c0] : memref<1xi32, #tpu.memory_space<smem>>
    %c0_i32 = arith.constant 0 : i32
    %c0_i32_0 = arith.constant 0 : i32
    %c0_i32_1 = arith.constant 0 : i32
    return %0, %c0_i32, %c0_i32_0 : i32, i32, i32
  }
  func.func @transform_4(%arg0: i32, %arg1: memref<1xi32, #tpu.memory_space<smem>>) -> (i32, i32, i32) {
    %c0 = arith.constant 0 : index
    %0 = memref.load %arg1[%c0] : memref<1xi32, #tpu.memory_space<smem>>
    %c0_i32 = arith.constant 0 : i32
    %c0_i32_0 = arith.constant 0 : i32
    %c0_i32_1 = arith.constant 0 : i32
    return %0, %c0_i32, %c0_i32_0 : i32, i32, i32
  }
  func.func @transform_5(%arg0: i32, %arg1: memref<1xi32, #tpu.memory_space<smem>>) -> (i32, i32) {
    %c0_i32 = arith.constant 0 : i32
    %c0_i32_0 = arith.constant 0 : i32
    return %arg0, %c0_i32 : i32, i32
  }
}

</mosaic_0001>

<bundles_post_ra>
// kernel: tpu_custom_call.1
= control target key start
LH: loop header
LB: loop body
LE: loop exit
PB: predicated region body
PF: predicated region fallthrough
CT: control target
= control target key end

     0   :  { %12 = vsyncpa [#allocation5], 0  ;;  %s602_s0 = inlined_call_operand.<no memory space> [shape: s32[1], index: 0, kind: input, shape index: {}]   ;;  %s603_s1 = inlined_call_operand.hbm [shape: f32[8,32], index: 1, kind: input, shape index: {}]   ;;  %s604_s2 = inlined_call_operand.hbm [shape: f32[32,128], index: 2, kind: input, shape index: {}]   ;;  %s605_s3 = inlined_call_operand.vmem [shape: f32[1,128], index: 3, kind: input, shape index: {}]   ;;  %s606_s4 = inlined_call_operand.hbm [shape: f32[3,128,128], index: 4, kind: input, shape index: {}]   ;;  %s607_s5 = inlined_call_operand.vmem [shape: f32[3,1,128], index: 5, kind: input, shape index: {}]   ;;  %s608_s6 = inlined_call_operand.hbm [shape: f32[8,128], index: 6, kind: output, shape index: {}]  }
   0x1   :  { %13 = vsyncpa [#allocation8], 0 }
   0x2   :  { %14 = vsyncpa [#allocation6], 0  ;;  %s492_s21 = smov [#allocation7]   ;;  %s396_s25 = scalar_lea.hbm %s604_s2, 512 }
   0x3   :  { %s30_s22 = sshll.u32 %s492_s21, 4  ;;  %p397_p0 = scmp.ne.s32.totalorder %s604_s2, %s396_s25  ;;  %s31_s22 = int_to_ptr.vmem [resolvable:$true] %s30_s22 }
   0x4   :  { %p400_p1 = scmp.lt.u32.totalorder %s396_s25, %s604_s2 }
   0x6   :  { %p402_p2 = pnand %p400_p1, %p397_p0 }
   0x8   :  { %405 = shalt.err (!%p402_p2)
}
   0x9   :  { %s406_s30 = scalar_lea.vmem %s31_s22, 512  ;;  %p411_p4 = scmp.lt.s32.totalorder %s31_s22, %s31_s22 }
   0xa   :  { %p407_p3 = scmp.ne.s32.totalorder %s31_s22, %s406_s30  ;;  %p412_p5 = scmp.lt.s32.totalorder %s406_s30, %s406_s30 }
   0xc   :  { %p413_p6 = por %p412_p5, %p411_p4 }
   0xe   :  { %p414_p7 = pnand %p413_p6, %p407_p3 }
  0x10   :  { %417 = shalt.err (!%p414_p7)
}
  0x11   :  { %s493_s7 = smov 128   ;;  %s494_s8 = smov 8  }
  0x12   :  { %36 = dma.hbm_to_vmem [thread:$0]  %s604_s2, 512, %s31_s22, [#allocation8], %s493_s7, %s493_s7, %s494_s8  }
  0x13   :  { %s495_s11 = smov [#allocation4]   ;;  %s288_s15 = sshll.u32 %s602_s0, 11 }
  0x14   :  { %s21_s12 = sshll.u32 %s495_s11, 4  ;;  %s418_s18 = scalar_lea.hbm %s603_s1, 128  ;;  %s22_s12 = int_to_ptr.vmem [resolvable:$true] %s21_s12 }
  0x15   :  { %p419_p8 = scmp.ne.s32.totalorder %s603_s1, %s418_s18  ;;  %p422_p9 = scmp.lt.u32.totalorder %s418_s18, %s603_s1 }
  0x17   :  { %p424_p10 = pnand %p422_p9, %p419_p8 }
  0x19   :  { %427 = shalt.err (!%p424_p10)
}
  0x1a   :  { %s428_s2 = scalar_lea.vmem %s22_s12, 128  ;;  %p433_p12 = scmp.lt.s32.totalorder %s22_s12, %s22_s12 }
  0x1b   :  { %p429_p11 = scmp.ne.s32.totalorder %s22_s12, %s428_s2  ;;  %p434_p13 = scmp.lt.s32.totalorder %s428_s2, %s428_s2 }
  0x1d   :  { %p435_p0 = por %p434_p13, %p433_p12 }
  0x1f   :  { %p436_p1 = pnand %p435_p0, %p429_p11 }
  0x21   :  { %439 = shalt.err (!%p436_p1)
}
  0x22   :  { %24 = dma.hbm_to_vmem [thread:$0]  %s603_s1, 128, %s22_s12, [#allocation5]  }
  0x23   :  { %s47_s27 = scalar_lea.hbm %s606_s4, %s288_s15  ;;  %s496_s28 = smov [#allocation9]  }
  0x24   :  { %s48_s29 = sshll.u32 %s496_s28, 4  ;;  %s440_s30 = scalar_lea.hbm %s47_s27, 2048  ;;  %s49_s29 = int_to_ptr.vmem [resolvable:$true] %s48_s29 }
  0x25   :  { %p441_p2 = scmp.ne.s32.totalorder %s47_s27, %s440_s30  ;;  %s442_s11 = scalar_lea.hbm %s606_s4, 6144 }
  0x26   :  { %p443_p3 = scmp.lt.u32.totalorder %s47_s27, %s606_s4  ;;  %p444_p4 = scmp.lt.u32.totalorder %s442_s11, %s440_s30 }
  0x27   :  { %p446_p6 = scmp.lt.u32.totalorder %s440_s30, %s47_s27 }
  0x28   :  { %p445_p5 = por %p444_p4, %p443_p3 }
  0x2a   :  { %p447_p7 = por %p446_p6, %p445_p5 }
  0x2c   :  { %p448_p8 = pnand %p447_p7, %p441_p2 }
  0x2e   :  { %451 = shalt.err (!%p448_p8)
}
  0x2f   :  { %s452_s1 = scalar_lea.vmem %s49_s29, 2048  ;;  %p457_p10 = scmp.lt.s32.totalorder %s49_s29, %s49_s29 }
  0x30   :  { %p453_p9 = scmp.ne.s32.totalorder %s49_s29, %s452_s1  ;;  %p458_p11 = scmp.lt.s32.totalorder %s452_s1, %s452_s1 }
  0x32   :  { %p459_p12 = por %p458_p11, %p457_p10 }
  0x34   :  { %p460_p13 = pnand %p459_p12, %p453_p9 }
  0x36   :  { %463 = shalt.err (!%p460_p13)
}
  0x37   :  { %54 = dma.hbm_to_vmem [thread:$0]  %s47_s27, 2048, %s49_s29, [#allocation8], %s493_s7, %s493_s7, %s494_s8  }
  0x38   :  { %486 = dma.done.wait [#allocation5], 128  }
  0x39   :  { %487 = vsyncadd [#allocation5], 4294967168 }
  0x3a   :  { %488 = dma.done.wait [#allocation8], 2560  }
  0x3b   :  { %489 = vsyncadd [#allocation8], 4294964736  ;;  %v497_v0 = vmov 0.0|0.0   ;;  %vm498_vm0 = vmmov 0   ;;  %v499_v1 = vmov 0.0   ;;  %v82_v2 = vld [vmem:[#allocation7] sm:$0xff] }
  0x3c   :  { %357 = vmatprep.subr.bf16.mxu0 %v497_v0  ;;  %319 = vmatprep.mubr.msk.f32.mxu0 %vm498_vm0, %v499_v1  ;;  %v83_v3 = vld [vmem:[#allocation7 + $0x8] sm:$0xff]  ;;  %v84_v4 = vld [vmem:[#allocation7 + $0x10] sm:$0xff]  ;;  %v85_v6 = vld [vmem:[#allocation7 + $0x18] sm:$0xff]  ;;  %vm93_vm1 = vcmask 261120   ;;  %p77_p0 = scmp.lt.s32.totalorder %s602_s0, 2  ;;  %s500_s20 = smov [#allocation10]  }
  0x3d   :  { %363 = vmatprep.subr.bf16.mxu1 %v497_v0  ;;  %354 = vmatprep.mubr.msk.f32.mxu1 %vm498_vm0, %v499_v1  ;;  %v358_v5 = vpack.c.bf16 %v83_v3, %v82_v2  ;;  %v168_v7 = vld [vmem:[#allocation9] sm:$0xff]  ;;  %v169_v8 = vld [vmem:[#allocation9 + $0x8] sm:$0xff]  ;;  %v170_v9 = vld [vmem:[#allocation9 + $0x10] sm:$0xff]  ;;  %v361_v11 = vpack.c.bf16 %v85_v6, %v84_v4 }
  0x3e   :  { %v171_v10 = vld [vmem:[#allocation9 + $0x18] sm:$0xff]  ;;  %v364_v12 = vpack.c.bf16 %v169_v8, %v168_v7  ;;  %v172_v14 = vld [vmem:[#allocation9 + $0x20] sm:$0xff]  ;;  %v173_v15 = vld [vmem:[#allocation9 + $0x28] sm:$0xff]  ;;  %s610_s0 = smov (!%p77_p0, %s602_s0), 2 }
  0x3f   :  { %359 = vmatpush3.bf16.msra.mxu0 %v358_v5  ;;  %v367_v13 = vpack.c.bf16 %v171_v10, %v170_v9  ;;  %v81_v16 = vld [vmem:[#allocation4] sm:$0xff]  ;;  %v370_v17 = vpack.c.bf16 %v173_v15, %v172_v14  ;;  %v174_v18 = vld [vmem:[#allocation9 + $0x30] sm:$0xff]  ;;  %v176_v21 = vld [vmem:[#allocation9 + $0x40] sm:$0xff]  ;;  %s79_s19 = scalar_lea.vmem %s607_s5, %s610_s0 }
  0x40   :  { %360 = vmatprep.subr.bf16.mxu0 %v497_v0  ;;  %365 = vmatpush3.bf16.msra.mxu1 %v364_v12  ;;  %v175_v19 = vld [vmem:[#allocation9 + $0x38] sm:$0xff]  ;;  %v177_v22 = vld [vmem:[#allocation9 + $0x48] sm:$0xff]  ;;  %v178_v24 = vld [vmem:[#allocation9 + $0x50] sm:$0xff] }
  0x41   :  { %366 = vmatprep.subr.bf16.mxu1 %v497_v0  ;;  %v373_v20 = vpack.c.bf16 %v175_v19, %v174_v18  ;;  %v376_v23 = vpack.c.bf16 %v177_v22, %v176_v21  ;;  %v179_v25 = vld [vmem:[#allocation9 + $0x58] sm:$0xff]  ;;  %v180_v27 = vld [vmem:[#allocation9 + $0x60] sm:$0xff]  ;;  %v181_v28 = vld [vmem:[#allocation9 + $0x68] sm:$0xff] }
  0x42   :  { %v379_v26 = vpack.c.bf16 %v179_v25, %v178_v24  ;;  %v382_v29 = vpack.c.bf16 %v181_v28, %v180_v27  ;;  %v182_v30 = vld [vmem:[#allocation9 + $0x70] sm:$0xff]  ;;  %v183_v31 = vld [vmem:[#allocation9 + $0x78] sm:$0xff] }
  0x43   :  { %362 = vmatpush3.bf16.msra.mxu0 %v361_v11  ;;  %v385_v32 = vpack.c.bf16 %v183_v31, %v182_v30  ;;  %v285_v33 = vld [vmem:[%s605_s3] ss:$0 sm:$0xff]  ;;  %s268_s3 = sshll.u32 %s500_s20, 4  ;;  %s269_s3 = int_to_ptr.vmem [resolvable:$true] %s268_s3 }
  0x44   :  { %368 = vmatpush3.bf16.msra.mxu1 %v367_v13  ;;  %v287_v38 = vld [vmem:[%s79_s19] ss:$0 sm:$0xff]  ;;  %s464_s21 = scalar_lea.vmem %s269_s3, 128  ;;  %p469_p2 = scmp.lt.s32.totalorder %s269_s3, %s269_s3 }
  0x45   :  { %369 = vmatprep.subr.bf16.mxu1 %v497_v0  ;;  %p465_p1 = scmp.ne.s32.totalorder %s269_s3, %s464_s21  ;;  %p470_p3 = scmp.lt.s32.totalorder %s464_s21, %s464_s21 }
  0x46   :  { %320 = vmatmul.mubr.msk.f32.vlgmr.msra.gmra.mrb[0].mxu0 %vm93_vm1, %v81_v16 }
  0x47   :  { %p471_p4 = por %p470_p3, %p469_p2 }
  0x48   :  { %371 = vmatpush3.bf16.msra.mxu1 %v370_v17 }
  0x49   :  { %372 = vmatprep.subr.bf16.mxu1 %v497_v0  ;;  %p472_p5 = pnand %p471_p4, %p465_p1 }
  0x4c   :  { %374 = vmatpush3.bf16.msra.mxu1 %v373_v20 }
  0x4d   :  { %375 = vmatprep.subr.bf16.mxu1 %v497_v0 }
  0x50   :  { %377 = vmatpush3.bf16.msra.mxu1 %v376_v23 }
  0x51   :  { %378 = vmatprep.subr.bf16.mxu1 %v497_v0 }
  0x54   :  { %380 = vmatpush3.bf16.msra.mxu1 %v379_v26 }
  0x55   :  { %381 = vmatprep.subr.bf16.mxu1 %v497_v0 }
  0x58   :  { %383 = vmatpush3.bf16.msra.mxu1 %v382_v29 }
  0x59   :  { %384 = vmatprep.subr.bf16.mxu1 %v497_v0 }
  0x5c   :  { %386 = vmatpush3.bf16.msra.mxu1 %v385_v32 }
 0x119   :  { %v163_v34 = vpop.f32.mrb[0].mxu0 }
 0x11a   :  { %v164_v35 = vadd.f32 %v285_v33, %v163_v34  ;;  %v321_v36 = vpop.f32.mrb[1].mxu0 }
 0x11c   :  { %v167_v37 = vmax.f32 %v164_v35, 0.0 }
 0x11e   :  { %355 = vmatmul.mubr.f32.vlgmr.msra.gmra.mrb[0].mxu1 %v167_v37 }
 0x1f1   :  { %v257_v39 = vpop.f32.mrb[0].mxu1 }
 0x1f2   :  { %v258_v40 = vadd.f32 %v287_v38, %v257_v39  ;;  %v356_v41 = vpop.f32.mrb[1].mxu1 }
 0x1f4   :  { %261 = vst [vmem:[#allocation10] sm:$0xff] %v258_v40 }
 0x1f5   :  { %475 = shalt.err (!%p472_p5)
}
 0x1f6   :  { %s476_s22 = scalar_lea.hbm %s608_s6, 128 }
 0x1f7   :  { %p477_p6 = scmp.ne.s32.totalorder %s608_s6, %s476_s22  ;;  %p480_p7 = scmp.lt.u32.totalorder %s476_s22, %s608_s6 }
 0x1f9   :  { %p482_p8 = pnand %p480_p7, %p477_p6 }
 0x1fb   :  { %485 = shalt.err (!%p482_p8)
}
 0x1fc   :  { %271 = dma.vmem_to_hbm [thread:$0]  %s269_s3, 128, %s608_s6, [#allocation6]  }
 0x1fd   :  { %490 = dma.done.wait [#allocation6], 128  }
 0x1fe   :  { %491 = vsyncadd [#allocation6], 4294967168 }
 0x1ff   :  { %275 = vsyncpa [#allocation5], 1 }
 0x200   :  { %276 = vsyncpa [#allocation8], 1 }
 0x201   :  { %277 = vsyncpa [#allocation6], 1 }

</bundles_post_ra>
